<compile_context>
chip_gen: v7x
topology: tpu7x:2x2x1
jax: 0.10.0
libtpu: 0.0.40
codegen_flags: <defaults>
</compile_context>

<pallas_src>
import functools

import jax
import jax.numpy as jnp
from jax.experimental import pallas as pl
from jax.experimental.pallas import tpu as pltpu


def _vmem_capacity_bytes():
    try:
        return int(pltpu.get_tpu_info().vmem_capacity_bytes)
    except Exception:
        return 64 * 1024 * 1024  # conservative fallback (v7x per-TC VMEM)


def spatial_kernel(x_ref, w_ref, shift_ref, o_ref, *, compute_dtype):
    # x_ref: (C, TL) input dtype; w_ref: (C, C) compute dtype
    # shift_ref: (C, 1) f32;      o_ref: (C, TL) output dtype
    x = x_ref[...].astype(compute_dtype)          # in-kernel cast (VPU slack is huge)
    y = jnp.dot(w_ref[...], x, preferred_element_type=jnp.float32)
    y = y + shift_ref[...]                        # conv bias + BN (folded), f32
    o_ref[...] = jnp.maximum(y, 0.0).astype(o_ref.dtype)   # ReLU epilogue


def _per_step_vmem(c, tl, x_bytes, cd_bytes, out_bytes):
    """Estimated VMEM working set for one pipelined grid step."""
    return (2 * c * tl * x_bytes            # x block, double-buffered
            + 2 * c * tl * out_bytes        # out block, double-buffered
            + 2 * c * c * cd_bytes          # resident weight (double-buffered)
            + c * tl * (cd_bytes + 4)       # in-kernel cast + f32 accumulator scratch
            + 2 * c * 4 * 8)                # shift + slack


def _choose_tile_l(c, l, x_bytes, cd_bytes, out_bytes, budget):
    """Largest power-of-two-multiple-of-128 L tile that fits the VMEM budget."""
    tl = 16384
    while tl > 128 and _per_step_vmem(c, tl, x_bytes, cd_bytes, out_bytes) > budget:
        tl //= 2
    if tl >= l:
        # Single full-extent block along L (block dim == array dim -> exempt
        # from the 128-divisibility rule, no masking needed).
        return l, 1
    return tl, pl.cdiv(l, tl)


def spatial_forward(x, w, b, gamma, beta, running_mean, running_var,
                    eps=1e-5, compute_dtype=jnp.bfloat16, out_dtype=None):
    """x: (N, C, L).  Returns (N, C, L) eval-mode forward.

    compute_dtype: matmul operand dtype (bf16 default, f32 for validation).
    out_dtype: output dtype (defaults to x.dtype; pass bf16 to halve store bytes).
    """
    N, C, L = x.shape
    out_dtype = x.dtype if out_dtype is None else out_dtype

    # Fold BatchNorm (eval) + conv bias in f32, cast the folded weight once:
    #   bn(Wx + b) = (Wx) * scale + shift
    #   scale = gamma / sqrt(var + eps);  shift = (b - mean) * scale + beta
    scale = (gamma / jnp.sqrt(running_var + eps)).astype(jnp.float32)
    w_fold = (w.astype(jnp.float32) * scale[:, None]).astype(compute_dtype)
    shift = ((b - running_mean) * scale + beta).astype(jnp.float32).reshape(C, 1)

    x_bytes = jnp.dtype(x.dtype).itemsize
    cd_bytes = jnp.dtype(compute_dtype).itemsize
    out_bytes = jnp.dtype(out_dtype).itemsize

    vmem_cap = _vmem_capacity_bytes()
    budget = int(vmem_cap * 0.7)
    TL, grid_l = _choose_tile_l(C, L, x_bytes, cd_bytes, out_bytes, budget)

    vmem_limit = int(min(
        _per_step_vmem(C, TL, x_bytes, cd_bytes, out_bytes) + (4 << 20),
        vmem_cap - (2 << 20)))
    vmem_limit = max(vmem_limit, 16 << 20)

    cost = pl.CostEstimate(
        flops=2 * N * C * C * L,
        transcendentals=0,
        bytes_accessed=N * C * L * (x_bytes + out_bytes) + C * C * cd_bytes + 2 * C * 4,
    )

    kernel = functools.partial(spatial_kernel, compute_dtype=compute_dtype)

    return pl.pallas_call(
        kernel,
        out_shape=jax.ShapeDtypeStruct((N, C, L), out_dtype),
        grid_spec=pl.GridSpec(
            grid=(N, grid_l),
            in_specs=[
                # x tile: batch dim squeezed, (C, TL) block.  C equals the full
                # array dim (sublane-rule exempt); trailing partial L block is
                # handled by Pallas masking when L % TL != 0.
                pl.BlockSpec((None, C, TL), lambda n, l: (n, 0, l)),
                # Weight / shift: constant index_map -> stays resident in VMEM.
                pl.BlockSpec((C, C), lambda n, l: (0, 0)),
                pl.BlockSpec((C, 1), lambda n, l: (0, 0)),
            ],
            out_specs=pl.BlockSpec((None, C, TL), lambda n, l: (n, 0, l)),
        ),
        compiler_params=pltpu.CompilerParams(
            dimension_semantics=("parallel", "parallel"),
            vmem_limit_bytes=vmem_limit,
        ),
        cost_estimate=cost,
    )(x, w_fold, shift)


def spatial_reference(x, w, b, gamma, beta, running_mean, running_var, eps=1e-5):
    # Pure-JAX reference of the same eval-mode forward (f32 throughout).
    y = jnp.einsum("oc,ncl->nol", w, x) + b[None, :, None]
    y = (y - running_mean[None, :, None]) / jnp.sqrt(running_var[None, :, None] + eps)
    y = y * gamma[None, :, None] + beta[None, :, None]
    return jnp.maximum(y, 0.0)


if __name__ == "__main__":
    N, C, L = 2, 4, 16  # batch, channels, sequence length

    key = jax.random.PRNGKey(0)
    kx, kw, kb, kg, kbe, km, kv = jax.random.split(key, 7)

    x = jax.random.normal(kx, (N, C, L), dtype=jnp.float32)

    # Conv1d kernel_size=1 weight is (C_out, C_in, 1) in torch -> squeezed (C_out, C_in).
    w = jax.random.normal(kw, (C, C), dtype=jnp.float32) * 0.5
    b = jax.random.normal(kb, (C,), dtype=jnp.float32) * 0.1
    gamma = 1.0 + 0.1 * jax.random.normal(kg, (C,), dtype=jnp.float32)
    beta = 0.1 * jax.random.normal(kbe, (C,), dtype=jnp.float32)
    running_mean = 0.1 * jax.random.normal(km, (C,), dtype=jnp.float32)
    running_var = 1.0 + 0.1 * jax.random.uniform(kv, (C,), dtype=jnp.float32)

    ref = spatial_reference(x, w, b, gamma, beta, running_mean, running_var)

    # Default fast path: bf16 matmul operands, f32 accumulation/epilogue.
    out = spatial_forward(x, w, b, gamma, beta, running_mean, running_var)
    out = jax.block_until_ready(out)
    assert out.shape == (N, C, L) and out.dtype == x.dtype
    assert jnp.allclose(out, ref, atol=3e-2, rtol=3e-2), "bf16 path mismatch vs reference"

    # f32 compute path: tight-tolerance check of the fused kernel itself.
    out_f32 = spatial_forward(x, w, b, gamma, beta, running_mean, running_var,
                              compute_dtype=jnp.float32)
    out_f32 = jax.block_until_ready(out_f32)
    assert jnp.allclose(out_f32, ref, atol=1e-5, rtol=1e-5), "f32 path mismatch vs reference"

    print("KERNEL_OK")
</pallas_src>

<mosaic_0001>
module attributes {stable_mosaic.version = 11 : i64} {
  func.func @spatial_kernel(%arg0: i32, %arg1: i32, %arg2: memref<1x4x16xf32, #tpu.memory_space<vmem>>, %arg3: memref<4x4xbf16, #tpu.memory_space<vmem>>, %arg4: memref<4x1xf32, #tpu.memory_space<vmem>>, %arg5: memref<1x4x16xf32, #tpu.memory_space<vmem>>) attributes {dimension_semantics = [#tpu.dimension_semantics<parallel>, #tpu.dimension_semantics<parallel>], iteration_bounds = array<i64: 2, 1>, scalar_prefetch = 0 : i64, scratch_operands = 0 : i64, tpu.core_type = #tpu.core_type<tc>, window_params = [{transform_indices = @transform_0, window_bounds = array<i64: 1, 4, 16>}, {pipeline_mode = #tpu.pipeline_mode<synchronous>, transform_indices = @transform_1, window_bounds = array<i64: 4, 4>}, {pipeline_mode = #tpu.pipeline_mode<synchronous>, transform_indices = @transform_2, window_bounds = array<i64: 4, 1>}, {transform_indices = @transform_3, window_bounds = array<i64: 1, 4, 16>}]} {
    %c0 = arith.constant 0 : index
    %c0_0 = arith.constant 0 : index
    %c0_1 = arith.constant 0 : index
    %0 = vector.load %arg2[%c0, %c0_0, %c0_1] : memref<1x4x16xf32, #tpu.memory_space<vmem>>, vector<1x4x16xf32>
    %1 = vector.shape_cast %0 : vector<1x4x16xf32> to vector<4x16xf32>
    %2 = arith.truncf %1 : vector<4x16xf32> to vector<4x16xbf16>
    %c0_2 = arith.constant 0 : index
    %c0_3 = arith.constant 0 : index
    %3 = vector.load %arg3[%c0_2, %c0_3] : memref<4x4xbf16, #tpu.memory_space<vmem>>, vector<4x4xbf16>
    %cst = arith.constant dense<0.000000e+00> : vector<4x16xf32>
    %4 = tpu.matmul %3, %2, %cst {dimension_numbers = #tpu.dot_dimension_numbers<[1], [0], [0], [1], [0, 0, 1, 1], [], []>} : vector<4x4xbf16>, vector<4x16xbf16>, vector<4x16xf32> -> vector<4x16xf32>
    %c0_4 = arith.constant 0 : index
    %c0_5 = arith.constant 0 : index
    %5 = vector.load %arg4[%c0_4, %c0_5] : memref<4x1xf32, #tpu.memory_space<vmem>>, vector<4x1xf32>
    %6 = vector.broadcast %5 : vector<4x1xf32> to vector<4x16xf32>
    %7 = arith.addf %4, %6 : vector<4x16xf32>
    %cst_6 = arith.constant 0.000000e+00 : f32
    %8 = vector.broadcast %cst_6 : f32 to vector<4x16xf32>
    %9 = arith.maximumf %7, %8 : vector<4x16xf32>
    %c0_7 = arith.constant 0 : index
    %c0_8 = arith.constant 0 : index
    %c0_9 = arith.constant 0 : index
    %10 = vector.load %arg5[%c0_7, %c0_8, %c0_9] : memref<1x4x16xf32, #tpu.memory_space<vmem>>, vector<1x4x16xf32>
    %11 = vector.shape_cast %10 : vector<1x4x16xf32> to vector<4x16xf32>
    %12 = vector.shape_cast %9 : vector<4x16xf32> to vector<1x4x16xf32>
    tpu.vector_store %arg5[%c0_7, %c0_8, %c0_9], %12 {strides = array<i32>} : memref<1x4x16xf32, #tpu.memory_space<vmem>>, vector<1x4x16xf32>,
    return
  }
  func.func @transform_0(%arg0: i32, %arg1: i32) -> (i32, i32, i32) {
    %c0_i32 = arith.constant 0 : i32
    %c0_i32_0 = arith.constant 0 : i32
    return %arg0, %c0_i32, %arg1 : i32, i32, i32
  }
  func.func @transform_1(%arg0: i32, %arg1: i32) -> (i32, i32) {
    %c0_i32 = arith.constant 0 : i32
    %c0_i32_0 = arith.constant 0 : i32
    %c0_i32_1 = arith.constant 0 : i32
    return %c0_i32, %c0_i32_0 : i32, i32
  }
  func.func @transform_2(%arg0: i32, %arg1: i32) -> (i32, i32) {
    %c0_i32 = arith.constant 0 : i32
    %c0_i32_0 = arith.constant 0 : i32
    %c0_i32_1 = arith.constant 0 : i32
    return %c0_i32, %c0_i32_0 : i32, i32
  }
  func.func @transform_3(%arg0: i32, %arg1: i32) -> (i32, i32, i32) {
    %c0_i32 = arith.constant 0 : i32
    %c0_i32_0 = arith.constant 0 : i32
    return %arg0, %c0_i32, %arg1 : i32, i32, i32
  }
}

</mosaic_0001>

<bundles_post_ra>
// kernel: tpu_custom_call.1
= control target key start
LH: loop header
LB: loop body
LE: loop exit
PB: predicated region body
PF: predicated region fallthrough
CT: control target
= control target key end

     0   :  { %8 = vsyncpa [#allocation3], 0  ;;  %s764_s0 = inlined_call_operand.hbm [shape: f32[2,4,16], index: 0, kind: input, shape index: {}]   ;;  %s765_s1 = inlined_call_operand.vmem [shape: bf16[4,4], index: 1, kind: input, shape index: {}]   ;;  %s766_s2 = inlined_call_operand.vmem [shape: f32[4,1], index: 2, kind: input, shape index: {}]   ;;  %s767_s3 = inlined_call_operand.hbm [shape: f32[2,4,16], index: 3, kind: output, shape index: {}]  }
   0x1   :  { %10 = vsyncpa [#allocation3 + $0x1], 0 }
   0x2   :  { %11 = vsyncpa [#allocation4], 0 }
   0x3   :  { %13 = vsyncpa [#allocation4 + $0x1], 0  ;;  %s586_s12 = smov 0   ;;  %s588_s13 = smov 0  }
   0x4   :  { %s590_s14 = smov 0   ;;  %s592_s15 = smov 0  }
   0x5   :  { %s594_s16 = smov 0   ;;  %s596_s17 = smov 0  }
   0x6 LB: > { %s359_s18 = sadd.s32 4294967295, %s559_s17   ;;  %s360_s19 = sadd.s32 4294967294, %s559_s17   ;;  %s559_s17 = sphi %s596_s17, %s19_s17   ;;  %s555_s16 = sphi %s594_s16, %s783_s16   ;;  %s551_s15 = sphi %s592_s15, %s782_s15   ;;  %s547_s14 = sphi %s590_s14, %s781_s14   ;;  %s543_s13 = sphi %s588_s13, %s780_s13   ;;  %s539_s12 = sphi %s586_s12, %s779_s12  }
   0x7   : > { %s31_s20 = sadd.s32 1, %s555_s16  ;;  %s40_s21 = sadd.s32 1, %s547_s14 }
   0x8   : > { %p33_p0 = scmp.ge.s32.totalorder %s31_s20, 2  ;;  %p47_p1 = scmp.ne.s32.totalorder %s547_s14, %s543_s13 }
   0x9   : > { %p48_p2 = scmp.eq.s32.totalorder %s559_s17, 0  ;;  %p53_p3 = scmp.ne.s32.totalorder %s543_s13, %s539_s12 }
   0xa   : > { %s785_s20 = smov (%p33_p0, %s31_s20), 0  ;;  %p54_p5 = scmp.eq.s32.totalorder %s359_s18, 0 }
   0xb   : > { %p627_p4 = por %p48_p2, %p47_p1  ;;  %s35_s23 = ssub.s32 %s555_s16, %s785_s20 }
   0xc   : > { %p121_p6 = scmp.eq.s32.totalorder %s359_s18, 1  ;;  %p38_p7 = scmp.eq.s32.totalorder %s35_s23, 0 }
   0xd   : > { %p633_p8 = por %p54_p5, %p53_p3  ;;  %p127_p10 = scmp.eq.s32.totalorder %s360_s19, 1 }
   0xe   : > { %p637_p9 = por %p121_p6, %p47_p1  ;;  %p393_p13 = scmp.lt.s32.totalorder %s559_s17, 2 }
   0xf   : > { %s642_s26 = scalar_select %p38_p7, %s547_s14, %s40_s21  }
  0x10   : > { %s771_s25 = scalar_select %p637_p9, 1, 0 }
  0x11   : > { %p644_p11 = por %p127_p10, %p53_p3  ;;  %s153_s28 = sand.u32 1, %s547_s14  }
  0x12   : > { %s363_s29 = sshll.u32 %s153_s28, 2  ;;  %s364_s30 = sshll.u32 %s555_s16, 6 }
  0x13   : > { %s772_s27 = scalar_select %p644_p11, 1, 0 }
  0x14   : > { %s655_s6 = scalar_lea.hbm %s764_s0, %s364_s30  ;;  %s157_s7 = scalar_lea.vmem [#allocation2], %s363_s29 }
  0x15   : > { %s165_s8 = sshll.u32 %s157_s7, 4  ;;  %p661_p0 = pnand %p393_p13, %p627_p4  ;;  %s657_s8 = int_to_ptr.vmem [resolvable:$true] %s165_s8 }
  0x16   : > { %s154_s10 = scalar_lea.sflag [#allocation3], %s153_s28  ;;  %s447_s11 = scalar_lea.hbm %s655_s6, 64 }
  0x17   : > { %p448_p3 = scmp.ne.s32.totalorder %s655_s6, %s447_s11  ;;  %p449_p5 = pneg %p661_p0 }
  0x18   : > { %s452_s21 = scalar_lea.hbm %s764_s0, 128  ;;  %p453_p4 = scmp.lt.u32.totalorder %s655_s6, %s764_s0 }
  0x19   : > { %p450_p6 = pnand %p449_p5, %p448_p3  ;;  %p454_p10 = scmp.lt.u32.totalorder %s452_s21, %s447_s11 }
  0x1a   : > { %p456_p12 = scmp.lt.u32.totalorder %s447_s11, %s655_s6 }
  0x1b   : > { %p451_p7 = pneg %p450_p6  ;;  %p455_p13 = por %p454_p10, %p453_p4 }
  0x1d   : > { %p457_p1 = por %p456_p12, %p455_p13 }
  0x1f   : > { %p458_p2 = pnand %p457_p1, %p451_p7 }
  0x21   : > { %461 = shalt.err (!%p458_p2)
}
  0x22   : > { %s462_s28 = scalar_lea.vmem %s657_s8, 64  ;;  %s561_s29 = smov [#allocation2]  }
  0x23   : > { %p463_p3 = scmp.ne.s32.totalorder %s657_s8, %s462_s28  ;;  %s467_s30 = sshll.u32 %s561_s29, 4  ;;  %s468_s30 = int_to_ptr.vmem [resolvable:$false] %s467_s30 }
  0x24   : > { %s469_s4 = scalar_lea.vmem %s468_s30, 128  ;;  %p470_p9 = scmp.lt.s32.totalorder %s657_s8, %s468_s30 }
  0x25   : > { %p465_p6 = pnand %p463_p3, %p449_p5  ;;  %p471_p4 = scmp.lt.s32.totalorder %s469_s4, %s462_s28 }
  0x27   : > { %p466_p11 = pneg %p465_p6  ;;  %p472_p10 = por %p471_p4, %p470_p9 }
  0x29   : > { %p473_p12 = pnand %p472_p10, %p466_p11 }
  0x2b   : > { %476 = shalt.err (!%p473_p12)
}
  0x2c   : > { %388 = dma.hbm_to_vmem [thread:$0]  (!%p661_p0), %s655_s6, 64, %s657_s8, %s154_s10  }
  0x2d   : > { %p774_p1 = scmp.lt.s32.totalorder %s559_s17, 3  ;;  %p775_p2 = scmp.ge.s32.totalorder %s559_s17, 1 }
  0x2f   : > { %p171_p5 = pnand %p775_p2, %p774_p1 }
  0x30   : > { %s697_s5 = sand.u32 (!%p171_p5), 1, %s543_s13  }
  0x31   : > { %174 = sbr.rel (%p171_p5) target bundleno = 294 (0x126), region = 32  ;;  %s366_s7 = sshll.u32 (!%p171_p5), %s697_s5, 2 }
  0x32   : > { %s177_s11 = scalar_lea.sflag (!%p171_p5), [#allocation3], %s697_s5  ;;  %s180_s18 = scalar_lea.vmem (!%p171_p5), [#allocation2], %s366_s7 }
  0x38   : > { %530 = dma.done.wait (%p633_p8), %s177_s11, 64  }
  0x39   : > { %532 = vsyncadd (%p633_p8), %s177_s11, 4294967232  ;;  %v562_v0 = vmov 0.0   ;;  %vm563_vm0 = vmmov 0   ;;  %v564_v1 = vmov 0   ;;  %v204_v2 = vld [vmem:[%s180_s18] sm:$0xf] }
  0x3a   : > { %375 = vmatprep.subr.bf16.mxu0 %v562_v0  ;;  %377 = vmatprep.mubr.msk.bf16.mxu0 %vm563_vm0, %v562_v0  ;;  %vm217_vm1 = vcmask 1041408   ;;  %v207_v3 = vld [vmem:[%s766_s2] sm:$0xf]  ;;  %v205_v4 = vpack.c.bf16 %v204_v2, %v204_v2  ;;  %vm213_vm2 = vcmask 31744   ;;  %s370_s10 = sshll.u32 %s551_s15, 6  ;;  %s202_s19 = scalar_lea.vmem [#allocation5], %s366_s7 }
  0x3b   : > { %446 = vset.pattern.permute.xlu0 %v564_v1  ;;  %v206_v6 = vld [vmem:[%s765_s1] sm:$0x3]  ;;  %s279_s21 = sshll.u32 %s202_s19, 4  ;;  %vm262_vm3 = vcmask 125952   ;;  %s715_s28 = scalar_lea.hbm %s767_s3, %s370_s10  ;;  %s717_s21 = int_to_ptr.vmem [resolvable:$true] %s279_s21 }
  0x3c   : > { %210 = vperm.xlu0 %446, %v207_v3   ;;  %v219_v5 = vsel %vm217_vm1, %v205_v4, 0  ;;  %s265_s15 = scalar_lea.sflag [#allocation4], %s697_s5  ;;  %s477_s29 = scalar_lea.vmem %s717_s21, 64 }
  0x3d   : > { %376 = vmatpush3.bf16.msra.mxu0 %v219_v5  ;;  %p478_p8 = scmp.ne.s32.totalorder %s717_s21, %s477_s29  ;;  %p776_p9 = scmp.ne.s32.totalorder %s771_s25, 0 }
  0x3e   : > { %s565_s30 = smov [#allocation5]  }
  0x3f   : > { %p479_p11 = pnand %p478_p8, %p776_p9  ;;  %s481_s4 = sshll.u32 %s565_s30, 4  ;;  %s482_s4 = int_to_ptr.vmem [resolvable:$false] %s481_s4 }
  0x40   : > { %378 = vmatmul.mubr.msk.bf16.vlgmr.msra.gmra.mrb[0].mxu0 %vm213_vm2, %v206_v6  ;;  %s483_s7 = scalar_lea.vmem %s482_s4, 128  ;;  %p484_p7 = scmp.lt.s32.totalorder %s717_s21, %s482_s4 }
  0x41   : > { %p480_p0 = pneg %p479_p11  ;;  %p485_p13 = scmp.lt.s32.totalorder %s483_s7, %s477_s29 }
  0x43   : > { %p486_p3 = por %p485_p13, %p484_p7 }
  0x45   : > { %p487_p6 = pnand %p486_p3, %p480_p0 }
  0xbb   : > { %v211_v7 = vpop.permute.xlu0 %210 }
 0x113   : > { %v255_v8 = vpop.f32.mrb[0].mxu0 }
 0x114   : > { %v256_v9 = vadd.f32 %v255_v8, %v211_v7  ;;  %v379_v10 = vpop.f32.mrb[1].mxu0 }
 0x115   : > { %v258_v11 = vpop.f32.mrb[2].mxu0 }
 0x116   : > { %v261_v12 = vmax.f32 %v256_v9, 0.0  ;;  %v380_v13 = vpop.f32.mrb[3].mxu0 }
 0x118   : > { %263 = vst.msk [vmem:[%s202_s19] sm:$0xf] %vm262_vm3, %v261_v12 }
 0x119   : > { %490 = shalt.err (!%p487_p6)
}
 0x11a   : > { %s491_s5 = scalar_lea.hbm %s715_s28, 64  ;;  %s495_s6 = scalar_lea.hbm %s767_s3, 128 }
 0x11b   : > { %p492_p4 = scmp.ne.s32.totalorder %s715_s28, %s491_s5  ;;  %p496_p1 = scmp.lt.u32.totalorder %s715_s28, %s767_s3 }
 0x11c   : > { %p497_p2 = scmp.lt.u32.totalorder %s495_s6, %s491_s5  ;;  %p499_p8 = scmp.lt.u32.totalorder %s491_s5, %s715_s28 }
 0x11d   : > { %p493_p10 = pnand %p492_p4, %p776_p9 }
 0x11e   : > { %p498_p5 = por %p497_p2, %p496_p1 }
 0x11f   : > { %p494_p12 = pneg %p493_p10 }
 0x120   : > { %p500_p11 = por %p499_p8, %p498_p5 }
 0x122   : > { %p501_p0 = pnand %p500_p11, %p494_p12 }
 0x124   : > { %504 = shalt.err (!%p501_p0)
}
 0x125   : > { %383 = dma.vmem_to_hbm [thread:$0]  (%p776_p9), %s717_s21, 64, %s715_s28, %s265_s15  }
 0x126 PF: > { %s291_s24 = sand.u32 1, %s539_s12   ;;  %p777_p7 = scmp.ne.s32.totalorder %s772_s27, 0 }
 0x127   : > { %p778_p13 = scmp.ge.s32.totalorder %s559_s17, 2  ;;  %s292_s10 = scalar_lea.sflag [#allocation4], %s291_s24 }
 0x129   : > { %p390_p3 = pnand %p778_p13, %p777_p7 }
 0x12b   : > { %534 = dma.done.wait (!%p390_p3), %s292_s10, 64  }
 0x12c   : > { %536 = vsyncadd (!%p390_p3), %s292_s10, 4294967232  ;;  %s19_s17 = sadd.s32 1, %s559_s17   ;;  %s779_s12 = smov %s543_s13 }
 0x12d   : > { %p16_p6 = scmp.ge.s32.totalorder %s19_s17, 4   ;;  %s780_s13 = smov %s547_s14 }
 0x12e   : > { %s781_s14 = smov %s642_s26  ;;  %s782_s15 = smov %s555_s16 }
 0x12f   : > { %s783_s16 = smov %s785_s20  ;;  %18 = sbr.rel (!%p16_p6) target bundleno = 6 (0x6), region = 77 }
 0x136   :  { %297 = vsyncpa [#allocation3], 1 }
 0x137   :  { %299 = vsyncpa [#allocation3 + $0x1], 1 }
 0x138   :  { %300 = vsyncpa [#allocation4], 1 }
 0x139   :  { %302 = vsyncpa [#allocation4 + $0x1], 1 }

</bundles_post_ra>
